<compile_context>
chip_gen: v7x
topology: tpu7x:2x2x1
jax: 0.10.0
libtpu: 0.0.40
codegen_flags: <defaults>
</compile_context>

<pallas_src>
import jax
import jax.numpy as jnp
from jax.experimental import pallas as pl
from jax.experimental.pallas import tpu as pltpu

_OUT_W = 8          # padded output lane width (true out_features = 2)
_STEP_CAP = 8192    # max batch-tile rows (amortizes per-grid-step overhead)
_K_SPLIT_MIN = 4096  # only tile the reduction dim above this many features


def _linear_probe_kernel(x_ref, w_ref, b_ref, o_ref, acc_ref):
    """One (batch-tile, k-tile) step of y = x @ W_pad + b_pad."""
    k = pl.program_id(1)

    @pl.when(k == 0)
    def _():
        acc_ref[...] = jnp.zeros_like(acc_ref)

    acc_ref[...] += jnp.dot(x_ref[...], w_ref[...],
                            preferred_element_type=jnp.float32)

    @pl.when(k == pl.num_programs(1) - 1)
    def _():
        o_ref[...] = (acc_ref[...] + b_ref[...]).astype(o_ref.dtype)


def _round_up(v, m):
    return ((v + m - 1) // m) * m


def _vmem_capacity_bytes():
    try:
        return int(pltpu.get_tpu_info().vmem_capacity_bytes)
    except Exception:
        return 64 * 1024 * 1024  # conservative fallback: v7x per-TensorCore VMEM


def _choose_k_tile(num_features):
    # A partial K tile is never allowed (out-of-bounds reads would corrupt the
    # reduction), so only tile K when a 128-lane-aligned divisor exists.
    if num_features <= _K_SPLIT_MIN:
        return num_features
    for tk in (2048, 1024, 512, 256, 128):
        if num_features % tk == 0:
            return tk
    # TODO(synk): huge F with no 128-aligned divisor would need a zero-padded
    # K dimension; left untiled here.
    return num_features


def _choose_batch_tile(batch, tk, x_itemsize, vmem_budget):
    sub = 16 if x_itemsize < 4 else 8            # sublane packing (bf16 vs f32)
    lanes_x = _round_up(tk, 128)                 # VMEM lane padding of x tile
    lanes_o = 128                                # (tb, 8) pads to 128 lanes in VMEM
    per_row = (2 * lanes_x * x_itemsize          # double-buffered x tile
               + 2 * lanes_o * 4                 # double-buffered output tile
               + lanes_o * 4)                    # f32 accumulator scratch
    fixed = (2 * _round_up(tk, 8) * 128 * 4      # weight double buffer
             + 2 * 8 * 128 * 4)                  # bias double buffer
    avail = max(vmem_budget - fixed, per_row)
    tb = max(sub, (avail // per_row // sub) * sub)
    tb = min(tb, _STEP_CAP)
    # Keep >= 2 grid steps whenever the batch allows it so v7x's two
    # TensorCores both get work (neutral on single-TC v5e/v6e).
    two_step = _round_up(max((batch + 1) // 2, 1), sub)
    tb = min(tb, max(sub, two_step))
    return tb


def probing_model_forward(x, weight, bias):
    """y = x @ weight.T + bias, matching nn.Linear(num_features, 2).

    x:      (B, F)  any float dtype (consumed in its native dtype)
    weight: (2, F)  PyTorch layout
    bias:   (2,)
    returns (B, 2)  float32
    """
    B, F = x.shape
    assert weight.shape == (2, F) and bias.shape == (2,)

    # Zero-pad the tiny parameters to the 8-wide padded output; keep f32.
    w_pad = jnp.zeros((F, _OUT_W), jnp.float32).at[:, :2].set(
        weight.T.astype(jnp.float32))
    b_pad = jnp.zeros((1, _OUT_W), jnp.float32).at[:, :2].set(
        bias.astype(jnp.float32).reshape(1, 2))

    cap = _vmem_capacity_bytes()
    budget = int(cap * 0.55)                       # tile-sizing budget
    tk = _choose_k_tile(F)
    x_itemsize = jnp.dtype(x.dtype).itemsize
    tb = _choose_batch_tile(B, tk, x_itemsize, budget)

    nb = pl.cdiv(B, tb)          # trailing partial batch tile masked by Pallas
    nk = F // tk

    # Explicit scoped-VMEM limit: actual footprint x ~1.5 margin, clamped to
    # 32 MiB..85% of physical (v5e's 16 MiB default would otherwise bite).
    footprint = (2 * tb * _round_up(tk, 128) * x_itemsize
                 + 2 * _round_up(tk, 8) * 128 * 4
                 + 3 * tb * 128 * 4
                 + 2 * 8 * 128 * 4)
    vmem_limit = int(min(cap * 0.85, max(32 * 1024 * 1024, footprint * 1.5)))

    out = pl.pallas_call(
        _linear_probe_kernel,
        out_shape=jax.ShapeDtypeStruct((B, _OUT_W), jnp.float32),
        grid_spec=pltpu.PrefetchScalarGridSpec(
            num_scalar_prefetch=0,
            grid=(nb, nk),
            in_specs=[
                # Streamed x batch/K tiles (native dtype, double-buffered).
                pl.BlockSpec((tb, tk), lambda i, k: (i, k)),
                # Weight / bias: same block revisited -> effectively VMEM
                # resident when nk == 1 (their double buffer is already
                # accounted for in the VMEM budget above).
                pl.BlockSpec((tk, _OUT_W), lambda i, k: (k, 0)),
                pl.BlockSpec((1, _OUT_W), lambda i, k: (0, 0)),
            ],
            out_specs=pl.BlockSpec((tb, _OUT_W), lambda i, k: (i, 0)),
            scratch_shapes=[pltpu.VMEM((tb, _OUT_W), jnp.float32)],
        ),
        compiler_params=pltpu.CompilerParams(
            dimension_semantics=("parallel", "arbitrary"),
            vmem_limit_bytes=vmem_limit,
        ),
    )(x, w_pad, b_pad)

    return out[:, :2]


if __name__ == "__main__":
    key = jax.random.PRNGKey(0)
    k_x, k_w, k_b = jax.random.split(key, 3)

    batch = 16
    num_features = 32

    # Deterministic parameter init mimicking nn.Linear default:
    # U(-1/sqrt(in_features), 1/sqrt(in_features))
    bound = 1.0 / jnp.sqrt(jnp.float32(num_features))
    weight = jax.random.uniform(k_w, (2, num_features), jnp.float32, -bound, bound)
    bias = jax.random.uniform(k_b, (2,), jnp.float32, -bound, bound)

    x = jax.random.normal(k_x, (batch, num_features), jnp.float32)

    y = probing_model_forward(x, weight, bias)
    jax.block_until_ready(y)

    # Cross-check against plain-JAX reference of the same math.
    y_ref = x @ weight.T + bias
    assert y.shape == (batch, 2)
    assert jnp.allclose(y, y_ref, atol=1e-5, rtol=1e-5)

    print("KERNEL_OK")
</pallas_src>

<mosaic_0001>
module attributes {stable_mosaic.version = 11 : i64} {
  func.func @_linear_probe_kernel(%arg0: i32, %arg1: i32, %arg2: memref<8x32xf32, #tpu.memory_space<vmem>>, %arg3: memref<32x8xf32, #tpu.memory_space<vmem>>, %arg4: memref<1x8xf32, #tpu.memory_space<vmem>>, %arg5: memref<8x8xf32, #tpu.memory_space<vmem>>, %arg6: memref<8x8xf32, #tpu.memory_space<vmem>>) attributes {dimension_semantics = [#tpu.dimension_semantics<parallel>, #tpu.dimension_semantics<arbitrary>], iteration_bounds = array<i64: 2, 1>, scalar_prefetch = 0 : i64, scratch_operands = 1 : i64, tpu.core_type = #tpu.core_type<tc>, window_params = [{transform_indices = @transform_0, window_bounds = array<i64: 8, 32>}, {transform_indices = @transform_1, window_bounds = array<i64: 32, 8>}, {pipeline_mode = #tpu.pipeline_mode<synchronous>, transform_indices = @transform_2, window_bounds = array<i64: 1, 8>}, {transform_indices = @transform_3, window_bounds = array<i64: 8, 8>}]} {
    %c0_i32 = arith.constant 0 : i32
    %0 = arith.cmpi eq, %arg1, %c0_i32 : i32
    %1 = arith.extui %0 : i1 to i32
    %c0_i32_0 = arith.constant 0 : i32
    %2 = arith.cmpi ne, %1, %c0_i32_0 : i32
    scf.if %2 {
      %cst_10 = arith.constant 0.000000e+00 : f32
      %12 = vector.broadcast %cst_10 : f32 to vector<8x8xf32>
      %c0_11 = arith.constant 0 : index
      %c0_12 = arith.constant 0 : index
      %13 = vector.load %arg6[%c0_11, %c0_12] : memref<8x8xf32, #tpu.memory_space<vmem>>, vector<8x8xf32>
      tpu.vector_store %arg6[%c0_11, %c0_12], %12 {strides = array<i32>} : memref<8x8xf32, #tpu.memory_space<vmem>>, vector<8x8xf32>,
    } else {
    }
    %c0 = arith.constant 0 : index
    %c0_1 = arith.constant 0 : index
    %3 = vector.load %arg6[%c0, %c0_1] : memref<8x8xf32, #tpu.memory_space<vmem>>, vector<8x8xf32>
    %c0_2 = arith.constant 0 : index
    %c0_3 = arith.constant 0 : index
    %4 = vector.load %arg2[%c0_2, %c0_3] : memref<8x32xf32, #tpu.memory_space<vmem>>, vector<8x32xf32>
    %c0_4 = arith.constant 0 : index
    %c0_5 = arith.constant 0 : index
    %5 = vector.load %arg3[%c0_4, %c0_5] : memref<32x8xf32, #tpu.memory_space<vmem>>, vector<32x8xf32>
    %cst = arith.constant dense<0.000000e+00> : vector<8x8xf32>
    %6 = tpu.matmul %4, %5, %cst {dimension_numbers = #tpu.dot_dimension_numbers<[1], [0], [0], [1], [0, 0, 1, 1], [], []>} : vector<8x32xf32>, vector<32x8xf32>, vector<8x8xf32> -> vector<8x8xf32>
    %7 = arith.addf %3, %6 : vector<8x8xf32>
    %c0_6 = arith.constant 0 : index
    %c0_7 = arith.constant 0 : index
    %8 = vector.load %arg6[%c0_6, %c0_7] : memref<8x8xf32, #tpu.memory_space<vmem>>, vector<8x8xf32>
    tpu.vector_store %arg6[%c0_6, %c0_7], %7 {strides = array<i32>} : memref<8x8xf32, #tpu.memory_space<vmem>>, vector<8x8xf32>,
    %c0_i32_8 = arith.constant 0 : i32
    %9 = arith.cmpi eq, %arg1, %c0_i32_8 : i32
    %10 = arith.extui %9 : i1 to i32
    %c0_i32_9 = arith.constant 0 : i32
    %11 = arith.cmpi ne, %10, %c0_i32_9 : i32
    scf.if %11 {
      %c0_10 = arith.constant 0 : index
      %c0_11 = arith.constant 0 : index
      %12 = vector.load %arg6[%c0_10, %c0_11] : memref<8x8xf32, #tpu.memory_space<vmem>>, vector<8x8xf32>
      %c0_12 = arith.constant 0 : index
      %c0_13 = arith.constant 0 : index
      %13 = vector.load %arg4[%c0_12, %c0_13] : memref<1x8xf32, #tpu.memory_space<vmem>>, vector<1x8xf32>
      %14 = vector.broadcast %13 : vector<1x8xf32> to vector<8x8xf32>
      %15 = arith.addf %12, %14 : vector<8x8xf32>
      %c0_14 = arith.constant 0 : index
      %c0_15 = arith.constant 0 : index
      %16 = vector.load %arg5[%c0_14, %c0_15] : memref<8x8xf32, #tpu.memory_space<vmem>>, vector<8x8xf32>
      tpu.vector_store %arg5[%c0_14, %c0_15], %15 {strides = array<i32>} : memref<8x8xf32, #tpu.memory_space<vmem>>, vector<8x8xf32>,
    } else {
    }
    return
  }
  func.func @transform_0(%arg0: i32, %arg1: i32) -> (i32, i32) {
    %c0_i32 = arith.constant 0 : i32
    return %arg0, %arg1 : i32, i32
  }
  func.func @transform_1(%arg0: i32, %arg1: i32) -> (i32, i32) {
    %c0_i32 = arith.constant 0 : i32
    %c0_i32_0 = arith.constant 0 : i32
    return %arg1, %c0_i32 : i32, i32
  }
  func.func @transform_2(%arg0: i32, %arg1: i32) -> (i32, i32) {
    %c0_i32 = arith.constant 0 : i32
    %c0_i32_0 = arith.constant 0 : i32
    %c0_i32_1 = arith.constant 0 : i32
    return %c0_i32, %c0_i32_0 : i32, i32
  }
  func.func @transform_3(%arg0: i32, %arg1: i32) -> (i32, i32) {
    %c0_i32 = arith.constant 0 : i32
    %c0_i32_0 = arith.constant 0 : i32
    return %arg0, %c0_i32 : i32, i32
  }
}

</mosaic_0001>

<bundles_post_ra>
// kernel: tpu_custom_call.1
= control target key start
LH: loop header
LB: loop body
LE: loop exit
PB: predicated region body
PF: predicated region fallthrough
CT: control target
= control target key end

     0   :  { %s501_s12 = smov 0   ;;  %s503_s13 = smov 0   ;;  %s552_s0 = inlined_call_operand.vmem [shape: f32[16,32], index: 0, kind: input, shape index: {}]   ;;  %s553_s1 = inlined_call_operand.vmem [shape: f32[32,8], index: 1, kind: input, shape index: {}]   ;;  %s554_s2 = inlined_call_operand.vmem [shape: f32[1,8], index: 2, kind: input, shape index: {}]   ;;  %s555_s3 = inlined_call_operand.vmem [shape: f32[16,8], index: 3, kind: output, shape index: {}]  }
   0x1   :  { %s505_s14 = smov 0  }
   0x2 LB: > { %s25_s15 = sadd.s32 1, %s472_s13  ;;  %p398_p0 = scmp.ge.s32.totalorder %s476_s14, 1  ;;  %s476_s14 = sphi %s505_s14, %s13_s14   ;;  %s472_s13 = sphi %s503_s13, %s557_s13   ;;  %s468_s12 = sphi %s501_s12, %s556_s12  }
   0x3   : > { %p27_p1 = scmp.ge.s32.totalorder %s25_s15, 2  ;;  %p164_p2 = scmp.lt.s32.totalorder %s476_s14, 3 }
   0x5   : > { %s559_s15 = smov (%p27_p1, %s25_s15), 0  ;;  %p165_p3 = pnand %p398_p0, %p164_p2 }
   0x6   : > { %v219_v0 = vld [vmem:[%s553_s1] sm:$0xff] (!%p165_p3)  ;;  %v220_v1 = vld [vmem:[%s553_s1 + $0x8] sm:$0xff] (!%p165_p3)  ;;  %v221_v2 = vld [vmem:[%s553_s1 + $0x10] sm:$0xff] (!%p165_p3)  ;;  %vm215_vm0 = vcmask (!%p165_p3), 64512   ;;  %v478_v3 = vmov (!%p165_p3), 0.0|0.0   ;;  %v479_v6 = vmov (!%p165_p3), 0.0  }
   0x7   : > { %168 = sbr.rel (%p165_p3) target bundleno = 243 (0xf3), region = 32  ;;  %421 = vmatprep.subr.bf16.mxu0 (!%p165_p3), %v478_v3  ;;  %v422_v4 = vpack.c.bf16 (!%p165_p3), %v220_v1, %v219_v0  ;;  %v222_v5 = vld [vmem:[%s553_s1 + $0x18] sm:$0xff] (!%p165_p3)  ;;  %216 = vst.msk [vmem:[#allocation2] sm:$0xff] (!%p165_p3), %vm215_vm0, %v479_v6  ;;  %p194_p4 = scmp.lt.s32.totalorder (!%p165_p3), %s468_s12, 1  ;;  %vm480_vm1 = vmmov (!%p165_p3), 0   ;;  %vm223_vm2 = vcmask (!%p165_p3), 261120  }
   0x8   : > { %418 = vmatprep.mubr.msk.f32.mxu0 (!%p165_p3), %vm480_vm1, %v479_v6  ;;  %v425_v7 = vpack.c.bf16 (!%p165_p3), %v222_v5, %v221_v2  ;;  %v402_v13 = vld [vmem:[%s554_s2] ss:$0 sm:$0xff] (!%p165_p3) }
   0x9   : > { %423 = vmatpush3.bf16.msra.mxu0 (!%p165_p3), %v422_v4 }
   0xa   : > { %424 = vmatprep.subr.bf16.mxu0 (!%p165_p3), %v478_v3 }
   0xd   : > { %426 = vmatpush3.bf16.msra.mxu0 (!%p165_p3), %v425_v7 }
   0xe   : > { %s561_s12 = smov (!%p194_p4, %s468_s12), 1  ;;  %v217_v9 = vld [vmem:[#allocation2] sm:$0xff] }
   0xf   : > { %s399_s24 = sshll.u32 %s561_s12, 3 }
  0x10   : > { %s200_s27 = scalar_lea.vmem %s552_s0, %s399_s24  ;;  %s210_s5 = scalar_lea.vmem %s555_s3, %s399_s24 }
  0x11   : > { %v218_v8 = vld [vmem:[%s200_s27] sm:$0xff] }
  0x12   : > { %419 = vmatmul.mubr.msk.f32.vlgmr.msra.gmra.mrb[0].mxu0 %vm223_vm2, %v218_v8 }
  0xe5   : > { %v293_v10 = vpop.f32.mrb[0].mxu0 }
  0xe6   : > { %v297_v11 = vadd.f32 %v293_v10, %v217_v9  ;;  %v420_v12 = vpop.f32.mrb[1].mxu0 }
  0xe8   : > { %299 = vst.msk [vmem:[#allocation2] sm:$0xff] %vm215_vm0, %v297_v11 }
  0xef   : > { %v303_v14 = vld [vmem:[#allocation2] sm:$0xff] }
  0xf0   : > { %v311_v15 = vadd.f32 %v402_v13, %v303_v14 }
  0xf2   : > { %312 = vst.msk [vmem:[%s210_s5] sm:$0xff] %vm215_vm0, %v311_v15 }
  0xf3 PF: > { %s13_s14 = sadd.s32 1, %s476_s14   ;;  %s556_s12 = smov %s472_s13 }
  0xf4   : > { %p10_p5 = scmp.ge.s32.totalorder %s13_s14, 4   ;;  %s557_s13 = smov %s559_s15 }
  0xf6   :  { %12 = sbr.rel (!%p10_p5) target bundleno = 2 (0x2), region = 73 }

</bundles_post_ra>
